<compile_context>
chip_gen: v6e
topology: v6e:2x2x1
jax: 0.10.0
libtpu: 0.0.40
codegen_flags: <defaults>
</compile_context>

<pallas_src>
from functools import partial

import numpy as np
import jax
import jax.numpy as jnp
from jax import lax
from jax.experimental import pallas as pl
from jax.experimental.pallas import tpu as pltpu


def _dft_bases(n):
    """Ortho 1-D DFT basis F[k, m] = exp(-2*pi*i*k*m/n)/sqrt(n) as the
    (cos, -sin) float64 numpy matrices (both symmetric)."""
    idx = np.arange(n, dtype=np.float64)
    ang = 2.0 * np.pi * np.outer(idx, idx) / n
    scale = 1.0 / np.sqrt(n)
    return np.cos(ang) * scale, -np.sin(ang) * scale


def _num_parallel_cores():
    """Size of the leading 'parallel' grid axis: 1 on known single-TC chips
    (v5e / v6e), 2 elsewhere (needed for the v7x 2-TC split; harmless if the
    chip actually has one TensorCore)."""
    try:
        kind = jax.devices()[0].device_kind.lower()
    except Exception:
        return 2
    if any(t in kind for t in ("v5e", "v5 lite", "v5lite",
                               "v6e", "v6 lite", "v6lite")):
        return 1
    return 2


def _vmem_capacity_bytes():
    try:
        return int(pltpu.get_tpu_info().vmem_capacity_bytes)
    except Exception:
        return 64 << 20          # conservative fallback (v7x per-TC size)


def _ffl_kernel(pred_ref, targ_ref, rowb_ref, colc_ref, cols_ref, out_ref,
                acc_ref, *, alpha, compute_dtype):
    step = pl.program_id(1)
    G, ph, pw = pred_ref.shape

    @pl.when(step == 0)
    def _init():
        acc_ref[...] = jnp.zeros_like(acc_ref)

    # Exact f32 difference, one cast for the MXU.  (Two bf16 quantisations —
    # here and after the transpose — are well inside the tolerance for the
    # default alpha; pass compute_dtype=jnp.float32 if tighter accuracy is
    # ever required.)
    diff2 = (pred_ref[...] - targ_ref[...]).reshape(G * ph, pw).astype(compute_dtype)

    # --- W-axis (row) DFT, batched over the whole block ---------------------
    # One matmul against the fused [CW | SW] basis: r = [A_r | A_i].
    r = jnp.dot(diff2, rowb_ref[...], preferred_element_type=jnp.float32)

    # --- per-image transpose of the partial spectrum (XLU) ------------------
    # CH / SH are symmetric, so the H-axis DFT of A is (A^T @ CH / SH)^T; we
    # keep the spectrum transposed (dist / max / sum are layout agnostic).
    rt = jnp.swapaxes(r.reshape(G, ph, 2 * pw), 1, 2)       # (G, 2*pw, ph) f32
    rt = rt.reshape(G * 2 * pw, ph).astype(compute_dtype)

    # --- H-axis (column) DFT, batched ----------------------------------------
    pc = jnp.dot(rt, colc_ref[...], preferred_element_type=jnp.float32)
    ps = jnp.dot(rt, cols_ref[...], preferred_element_type=jnp.float32)
    pc = pc.reshape(G, 2, pw, ph)    # [:, 0] = A_r^T @ CH,  [:, 1] = A_i^T @ CH
    ps = ps.reshape(G, 2, pw, ph)    # [:, 0] = A_r^T @ SH,  [:, 1] = A_i^T @ SH

    re = pc[:, 0] - ps[:, 1]         # Y_re^T  (G, pw, ph)
    im = ps[:, 0] + pc[:, 1]         # Y_im^T
    dist = re * re + im * im         # freq_distance (transposed), f32

    # --- per-image focal weighting + reduction --------------------------------
    m = jnp.max(jnp.max(dist, axis=2), axis=1, keepdims=True)          # (G, 1)
    if alpha == 1.0:
        # sum(w * dist) = sum(dist^1.5) / sqrt(max(dist))
        num = jnp.sum(jnp.sum(dist * jnp.sqrt(dist), axis=2),
                      axis=1, keepdims=True)
        contrib = num * lax.rsqrt(m)
    else:
        num = jnp.sum(jnp.sum(dist ** (1.0 + 0.5 * alpha), axis=2),
                      axis=1, keepdims=True)
        contrib = num * (m ** (-0.5 * alpha))
    # max == 0  ->  the reference zeroes the NaN weights (zero contribution).
    contrib = jnp.where(m > 0.0, contrib, jnp.zeros_like(contrib))

    acc_ref[...] = acc_ref[...] + jnp.sum(contrib, axis=0, keepdims=True)

    @pl.when(step == pl.num_programs(1) - 1)
    def _flush():
        # Single lane-dense write per core instead of a per-step output RMW.
        out_ref[...] = acc_ref[...] + jnp.zeros_like(out_ref)


def focal_frequency_loss(pred, target, *, loss_weight=1.0, alpha=1.0,
                         patch_factor=1, compute_dtype=jnp.bfloat16):
    """Forward pass of FocalFrequencyLoss with default options
    (avg_spectrum=False, log_matrix=False, batch_matrix=False, matrix=None)."""
    # The closed-form weight max(sqrt(dist)^alpha) == max(dist)^(alpha/2) and
    # the implicit clip-to-[0,1] no-op both require alpha >= 0 (the module's
    # default is 1.0).
    assert alpha >= 0.0, "focal_frequency_loss kernel requires alpha >= 0"
    N, C, H, W = pred.shape
    pf = int(patch_factor)
    assert H % pf == 0 and W % pf == 0, "Patch factor should divide H and W"
    ph, pw = H // pf, W // pf
    # TODO(synk): patch sizes that are not multiples of 8 rely on Mosaic
    #             relayouts for the in-kernel reshapes (typical sizes are fine).

    def to_images(x):
        # (N, C, H, W) -> (N*pf*pf*C, ph, pw) matching torch's patch stacking.
        x = x.reshape(N, C, pf, ph, pf, pw)
        x = jnp.transpose(x, (0, 2, 4, 1, 3, 5))
        return x.reshape(N * pf * pf * C, ph, pw).astype(jnp.float32)

    p_imgs = to_images(pred)
    t_imgs = to_images(target)
    M = p_imgs.shape[0]

    ncores = _num_parallel_cores()
    vmem_cap = _vmem_capacity_bytes()
    # Per-block input cap: ~2 MiB on 128-MiB-VMEM chips (v5e/v6e), ~1 MiB on
    # v7x (64 MiB/TC) so 2 inputs x 2 buffers + f32 intermediates stay inside
    # the scoped VMEM limit with headroom.
    input_cap = (2 << 20) if vmem_cap >= (100 << 20) else (1 << 20)
    vmem_limit = int(min(vmem_cap, max(32 << 20, min(vmem_cap // 2, 64 << 20))))

    images_per_core = -(-M // ncores)
    G = int(max(1, min(images_per_core, input_cap // (ph * pw * 4))))
    blocks_per_core = -(-images_per_core // G)
    M_pad = ncores * blocks_per_core * G
    if M_pad > M:
        padn = M_pad - M
        # Zero-padded images give diff == 0 -> zero contribution (guarded).
        p_imgs = jnp.pad(p_imgs, ((0, padn), (0, 0), (0, 0)))
        t_imgs = jnp.pad(t_imgs, ((0, padn), (0, 0), (0, 0)))

    cw, sw = _dft_bases(pw)
    chm, shm = _dft_bases(ph)
    row_basis = jnp.asarray(np.concatenate([cw, sw], axis=1), dtype=compute_dtype)
    col_cos = jnp.asarray(chm, dtype=compute_dtype)
    col_sin = jnp.asarray(shm, dtype=compute_dtype)

    img_map = lambda c, i: (c * blocks_per_core + i, 0, 0)
    const_map = lambda c, i: (0, 0)

    kernel = partial(_ffl_kernel, alpha=float(alpha), compute_dtype=compute_dtype)

    basis_bytes = (2 * pw * pw + 2 * ph * ph) * jnp.dtype(compute_dtype).itemsize
    flops = int(M_pad * (4 * ph * pw * pw + 8 * ph * ph * pw + 10 * ph * pw))
    cost = pl.CostEstimate(
        flops=flops,
        transcendentals=int(M_pad * (ph * pw + 2)),
        bytes_accessed=int(2 * M_pad * ph * pw * 4 + basis_bytes
                           + ncores * 8 * 128 * 4),
    )

    partials = pl.pallas_call(
        kernel,
        out_shape=jax.ShapeDtypeStruct((ncores, 8, 128), jnp.float32),
        grid_spec=pltpu.PrefetchScalarGridSpec(
            num_scalar_prefetch=0,
            grid=(ncores, blocks_per_core),
            in_specs=[
                pl.BlockSpec((G, ph, pw), img_map),       # pred images
                pl.BlockSpec((G, ph, pw), img_map),       # target images
                pl.BlockSpec((pw, 2 * pw), const_map),    # fused [CW | SW]
                pl.BlockSpec((ph, ph), const_map),        # CH (resident)
                pl.BlockSpec((ph, ph), const_map),        # SH (resident)
            ],
            out_specs=pl.BlockSpec((1, 8, 128), lambda c, i: (c, 0, 0)),
            scratch_shapes=[pltpu.VMEM((1, 1), jnp.float32)],
        ),
        compiler_params=pltpu.CompilerParams(
            dimension_semantics=("parallel", "arbitrary"),
            vmem_limit_bytes=vmem_limit),
        cost_estimate=cost,
    )(p_imgs, t_imgs, row_basis, col_cos, col_sin)

    total = jnp.sum(partials[:, 0, 0])
    # Mean over (N, pf*pf, C, ph, pw) elements; padded images contribute 0.
    return total / jnp.float32(M * ph * pw) * jnp.float32(loss_weight)


def _reference_ffl_numpy(pred, target, *, loss_weight=1.0, alpha=1.0,
                         patch_factor=1):
    """float64 numpy re-implementation of the PyTorch module (default flags)."""
    p = np.asarray(pred, dtype=np.float64)
    t = np.asarray(target, dtype=np.float64)
    N, C, H, W = p.shape
    pf = patch_factor
    ph, pw = H // pf, W // pf

    def patchify(x):
        x = x.reshape(N, C, pf, ph, pf, pw).transpose(0, 2, 4, 1, 3, 5)
        return x.reshape(N, pf * pf, C, ph, pw)

    pfreq = np.fft.fft2(patchify(p), norm="ortho")
    tfreq = np.fft.fft2(patchify(t), norm="ortho")
    d = pfreq - tfreq
    dist = d.real ** 2 + d.imag ** 2
    w = np.sqrt(dist) ** alpha
    mx = w.max(axis=(-2, -1), keepdims=True)
    with np.errstate(divide="ignore", invalid="ignore"):
        w = w / mx
    w = np.nan_to_num(w, nan=0.0)
    w = np.clip(w, 0.0, 1.0)
    return float(np.mean(w * dist) * loss_weight)


if __name__ == "__main__":
    key = jax.random.PRNGKey(0)
    kp, kt = jax.random.split(key)
    N, C, H, W = 2, 4, 16, 16
    pred = jax.random.normal(kp, (N, C, H, W), dtype=jnp.float32)
    target = jax.random.normal(kt, (N, C, H, W), dtype=jnp.float32)

    loss_fn = jax.jit(lambda a, b: focal_frequency_loss(a, b))
    loss = jax.block_until_ready(loss_fn(pred, target))
    loss_val = float(loss)

    ref_val = _reference_ffl_numpy(np.asarray(pred), np.asarray(target))
    rel_err = abs(loss_val - ref_val) / max(abs(ref_val), 1e-12)

    assert np.isfinite(loss_val)
    assert rel_err < 0.1, f"kernel={loss_val} reference={ref_val} rel={rel_err}"
    print("KERNEL_OK")
</pallas_src>

<mosaic_0001>
module attributes {stable_mosaic.version = 11 : i64} {
  func.func @_ffl_kernel(%arg0: i32, %arg1: i32, %arg2: memref<4x16x16xf32, #tpu.memory_space<vmem>>, %arg3: memref<4x16x16xf32, #tpu.memory_space<vmem>>, %arg4: memref<16x32xbf16, #tpu.memory_space<vmem>>, %arg5: memref<16x16xbf16, #tpu.memory_space<vmem>>, %arg6: memref<16x16xbf16, #tpu.memory_space<vmem>>, %arg7: memref<1x8x128xf32, #tpu.memory_space<vmem>>, %arg8: memref<1x1xf32, #tpu.memory_space<vmem>>) attributes {dimension_semantics = [#tpu.dimension_semantics<parallel>, #tpu.dimension_semantics<arbitrary>], iteration_bounds = array<i64: 2, 1>, scalar_prefetch = 0 : i64, scratch_operands = 1 : i64, tpu.core_type = #tpu.core_type<tc>, window_params = [{transform_indices = @transform_0, window_bounds = array<i64: 4, 16, 16>}, {transform_indices = @transform_1, window_bounds = array<i64: 4, 16, 16>}, {pipeline_mode = #tpu.pipeline_mode<synchronous>, transform_indices = @transform_2, window_bounds = array<i64: 16, 32>}, {pipeline_mode = #tpu.pipeline_mode<synchronous>, transform_indices = @transform_3, window_bounds = array<i64: 16, 16>}, {pipeline_mode = #tpu.pipeline_mode<synchronous>, transform_indices = @transform_4, window_bounds = array<i64: 16, 16>}, {transform_indices = @transform_5, window_bounds = array<i64: 1, 8, 128>}]} {
    %c0_i32 = arith.constant 0 : i32
    %0 = arith.cmpi eq, %arg1, %c0_i32 : i32
    %1 = arith.extui %0 : i1 to i32
    %c0_i32_0 = arith.constant 0 : i32
    %2 = arith.cmpi ne, %1, %c0_i32_0 : i32
    scf.if %2 {
      %cst_27 = arith.constant 0.000000e+00 : f32
      %55 = vector.broadcast %cst_27 : f32 to vector<1x1xf32>
      %c0_28 = arith.constant 0 : index
      %c0_29 = arith.constant 0 : index
      %56 = vector.load %arg8[%c0_28, %c0_29] : memref<1x1xf32, #tpu.memory_space<vmem>>, vector<1x1xf32>
      tpu.vector_store %arg8[%c0_28, %c0_29], %55 {strides = array<i32>} : memref<1x1xf32, #tpu.memory_space<vmem>>, vector<1x1xf32>,
    } else {
    }
    %c0 = arith.constant 0 : index
    %c0_1 = arith.constant 0 : index
    %c0_2 = arith.constant 0 : index
    %3 = vector.load %arg2[%c0, %c0_1, %c0_2] : memref<4x16x16xf32, #tpu.memory_space<vmem>>, vector<4x16x16xf32>
    %c0_3 = arith.constant 0 : index
    %c0_4 = arith.constant 0 : index
    %c0_5 = arith.constant 0 : index
    %4 = vector.load %arg3[%c0_3, %c0_4, %c0_5] : memref<4x16x16xf32, #tpu.memory_space<vmem>>, vector<4x16x16xf32>
    %5 = arith.subf %3, %4 : vector<4x16x16xf32>
    %6 = vector.shape_cast %5 : vector<4x16x16xf32> to vector<64x16xf32>
    %7 = arith.truncf %6 : vector<64x16xf32> to vector<64x16xbf16>
    %c0_6 = arith.constant 0 : index
    %c0_7 = arith.constant 0 : index
    %8 = vector.load %arg4[%c0_6, %c0_7] : memref<16x32xbf16, #tpu.memory_space<vmem>>, vector<16x32xbf16>
    %cst = arith.constant dense<0.000000e+00> : vector<64x32xf32>
    %9 = tpu.matmul %7, %8, %cst {dimension_numbers = #tpu.dot_dimension_numbers<[1], [0], [0], [1], [0, 0, 1, 1], [], []>} : vector<64x16xbf16>, vector<16x32xbf16>, vector<64x32xf32> -> vector<64x32xf32>
    %10 = vector.shape_cast %9 : vector<64x32xf32> to vector<4x16x32xf32>
    %11 = tpu.transpose %10, [0, 2, 1] : vector<4x16x32xf32> -> vector<4x32x16xf32>
    %12 = vector.shape_cast %11 : vector<4x32x16xf32> to vector<128x16xf32>
    %13 = arith.truncf %12 : vector<128x16xf32> to vector<128x16xbf16>
    %c0_8 = arith.constant 0 : index
    %c0_9 = arith.constant 0 : index
    %14 = vector.load %arg5[%c0_8, %c0_9] : memref<16x16xbf16, #tpu.memory_space<vmem>>, vector<16x16xbf16>
    %cst_10 = arith.constant dense<0.000000e+00> : vector<128x16xf32>
    %15 = tpu.matmul %13, %14, %cst_10 {dimension_numbers = #tpu.dot_dimension_numbers<[1], [0], [0], [1], [0, 0, 1, 1], [], []>} : vector<128x16xbf16>, vector<16x16xbf16>, vector<128x16xf32> -> vector<128x16xf32>
    %c0_11 = arith.constant 0 : index
    %c0_12 = arith.constant 0 : index
    %16 = vector.load %arg6[%c0_11, %c0_12] : memref<16x16xbf16, #tpu.memory_space<vmem>>, vector<16x16xbf16>
    %cst_13 = arith.constant dense<0.000000e+00> : vector<128x16xf32>
    %17 = tpu.matmul %13, %16, %cst_13 {dimension_numbers = #tpu.dot_dimension_numbers<[1], [0], [0], [1], [0, 0, 1, 1], [], []>} : vector<128x16xbf16>, vector<16x16xbf16>, vector<128x16xf32> -> vector<128x16xf32>
    %18 = vector.shape_cast %15 : vector<128x16xf32> to vector<4x2x16x16xf32>
    %19 = vector.shape_cast %17 : vector<128x16xf32> to vector<4x2x16x16xf32>
    %20 = vector.extract_strided_slice %18 {offsets = [0, 0, 0, 0], sizes = [4, 1, 16, 16], strides = [1, 1, 1, 1]} : vector<4x2x16x16xf32> to vector<4x1x16x16xf32>
    %21 = vector.shape_cast %20 : vector<4x1x16x16xf32> to vector<4x16x16xf32>
    %22 = vector.extract_strided_slice %19 {offsets = [0, 1, 0, 0], sizes = [4, 1, 16, 16], strides = [1, 1, 1, 1]} : vector<4x2x16x16xf32> to vector<4x1x16x16xf32>
    %23 = vector.shape_cast %22 : vector<4x1x16x16xf32> to vector<4x16x16xf32>
    %24 = arith.subf %21, %23 : vector<4x16x16xf32>
    %25 = vector.extract_strided_slice %19 {offsets = [0, 0, 0, 0], sizes = [4, 1, 16, 16], strides = [1, 1, 1, 1]} : vector<4x2x16x16xf32> to vector<4x1x16x16xf32>
    %26 = vector.shape_cast %25 : vector<4x1x16x16xf32> to vector<4x16x16xf32>
    %27 = vector.extract_strided_slice %18 {offsets = [0, 1, 0, 0], sizes = [4, 1, 16, 16], strides = [1, 1, 1, 1]} : vector<4x2x16x16xf32> to vector<4x1x16x16xf32>
    %28 = vector.shape_cast %27 : vector<4x1x16x16xf32> to vector<4x16x16xf32>
    %29 = arith.addf %26, %28 : vector<4x16x16xf32>
    %30 = arith.mulf %24, %24 : vector<4x16x16xf32>
    %31 = arith.mulf %29, %29 : vector<4x16x16xf32>
    %32 = arith.addf %30, %31 : vector<4x16x16xf32>
    %cst_14 = arith.constant dense<0xFF800000> : vector<4x16xf32>
    %33 = vector.multi_reduction <maximumf>, %32, %cst_14 [2] : vector<4x16x16xf32> to vector<4x16xf32>
    %cst_15 = arith.constant dense<0xFF800000> : vector<4xf32>
    %34 = vector.multi_reduction <maximumf>, %33, %cst_15 [1] : vector<4x16xf32> to vector<4xf32>
    %35 = vector.shape_cast %34 : vector<4xf32> to vector<4x1xf32>
    %36 = math.sqrt %32 : vector<4x16x16xf32>
    %37 = arith.mulf %32, %36 : vector<4x16x16xf32>
    %cst_16 = arith.constant dense<0.000000e+00> : vector<4x16xf32>
    %38 = vector.multi_reduction <add>, %37, %cst_16 [2] : vector<4x16x16xf32> to vector<4x16xf32>
    %cst_17 = arith.constant dense<0.000000e+00> : vector<4xf32>
    %39 = vector.multi_reduction <add>, %38, %cst_17 [1] : vector<4x16xf32> to vector<4xf32>
    %40 = vector.shape_cast %39 : vector<4xf32> to vector<4x1xf32>
    %41 = math.rsqrt %35 : vector<4x1xf32>
    %42 = arith.mulf %40, %41 : vector<4x1xf32>
    %cst_18 = arith.constant 0.000000e+00 : f32
    %43 = vector.broadcast %cst_18 : f32 to vector<4x1xf32>
    %44 = arith.cmpf ogt, %35, %43 : vector<4x1xf32>
    %cst_19 = arith.constant 0.000000e+00 : f32
    %45 = vector.broadcast %cst_19 : f32 to vector<4x1xf32>
    %46 = arith.select %44, %42, %45 : vector<4x1xi1>, vector<4x1xf32>
    %c0_20 = arith.constant 0 : index
    %c0_21 = arith.constant 0 : index
    %47 = vector.load %arg8[%c0_20, %c0_21] : memref<1x1xf32, #tpu.memory_space<vmem>>, vector<1x1xf32>
    %cst_22 = arith.constant dense<0.000000e+00> : vector<1xf32>
    %48 = vector.multi_reduction <add>, %46, %cst_22 [0] : vector<4x1xf32> to vector<1xf32>
    %49 = vector.shape_cast %48 : vector<1xf32> to vector<1x1xf32>
    %50 = arith.addf %47, %49 : vector<1x1xf32>
    %c0_23 = arith.constant 0 : index
    %c0_24 = arith.constant 0 : index
    %51 = vector.load %arg8[%c0_23, %c0_24] : memref<1x1xf32, #tpu.memory_space<vmem>>, vector<1x1xf32>
    tpu.vector_store %arg8[%c0_23, %c0_24], %50 {strides = array<i32>} : memref<1x1xf32, #tpu.memory_space<vmem>>, vector<1x1xf32>,
    %c0_i32_25 = arith.constant 0 : i32
    %52 = arith.cmpi eq, %arg1, %c0_i32_25 : i32
    %53 = arith.extui %52 : i1 to i32
    %c0_i32_26 = arith.constant 0 : i32
    %54 = arith.cmpi ne, %53, %c0_i32_26 : i32
    scf.if %54 {
      %c0_27 = arith.constant 0 : index
      %c0_28 = arith.constant 0 : index
      %55 = vector.load %arg8[%c0_27, %c0_28] : memref<1x1xf32, #tpu.memory_space<vmem>>, vector<1x1xf32>
      %cst_29 = arith.constant 0.000000e+00 : f32
      %56 = vector.broadcast %cst_29 : f32 to vector<1x8x128xf32>
      %57 = vector.shape_cast %55 : vector<1x1xf32> to vector<1x1x1xf32>
      %58 = vector.broadcast %57 : vector<1x1x1xf32> to vector<1x8x128xf32>
      %59 = arith.addf %58, %56 : vector<1x8x128xf32>
      %c0_30 = arith.constant 0 : index
      %c0_31 = arith.constant 0 : index
      %c0_32 = arith.constant 0 : index
      %60 = vector.load %arg7[%c0_30, %c0_31, %c0_32] : memref<1x8x128xf32, #tpu.memory_space<vmem>>, vector<1x8x128xf32>
      tpu.vector_store %arg7[%c0_30, %c0_31, %c0_32], %59 {strides = array<i32>} : memref<1x8x128xf32, #tpu.memory_space<vmem>>, vector<1x8x128xf32>,
    } else {
    }
    return
  }
  func.func @transform_0(%arg0: i32, %arg1: i32) -> (i32, i32, i32) {
    %c1_i32 = arith.constant 1 : i32
    %0 = arith.muli %arg0, %c1_i32 : i32
    %1 = arith.addi %0, %arg1 : i32
    %c0_i32 = arith.constant 0 : i32
    %c0_i32_0 = arith.constant 0 : i32
    %c0_i32_1 = arith.constant 0 : i32
    return %1, %c0_i32, %c0_i32_0 : i32, i32, i32
  }
  func.func @transform_1(%arg0: i32, %arg1: i32) -> (i32, i32, i32) {
    %c1_i32 = arith.constant 1 : i32
    %0 = arith.muli %arg0, %c1_i32 : i32
    %1 = arith.addi %0, %arg1 : i32
    %c0_i32 = arith.constant 0 : i32
    %c0_i32_0 = arith.constant 0 : i32
    %c0_i32_1 = arith.constant 0 : i32
    return %1, %c0_i32, %c0_i32_0 : i32, i32, i32
  }
  func.func @transform_2(%arg0: i32, %arg1: i32) -> (i32, i32) {
    %c0_i32 = arith.constant 0 : i32
    %c0_i32_0 = arith.constant 0 : i32
    %c0_i32_1 = arith.constant 0 : i32
    return %c0_i32, %c0_i32_0 : i32, i32
  }
  func.func @transform_3(%arg0: i32, %arg1: i32) -> (i32, i32) {
    %c0_i32 = arith.constant 0 : i32
    %c0_i32_0 = arith.constant 0 : i32
    %c0_i32_1 = arith.constant 0 : i32
    return %c0_i32, %c0_i32_0 : i32, i32
  }
  func.func @transform_4(%arg0: i32, %arg1: i32) -> (i32, i32) {
    %c0_i32 = arith.constant 0 : i32
    %c0_i32_0 = arith.constant 0 : i32
    %c0_i32_1 = arith.constant 0 : i32
    return %c0_i32, %c0_i32_0 : i32, i32
  }
  func.func @transform_5(%arg0: i32, %arg1: i32) -> (i32, i32, i32) {
    %c0_i32 = arith.constant 0 : i32
    %c0_i32_0 = arith.constant 0 : i32
    %c0_i32_1 = arith.constant 0 : i32
    return %arg0, %c0_i32, %c0_i32_0 : i32, i32, i32
  }
}

</mosaic_0001>

<bundles_post_ra>
// kernel: _lambda_.1
= control target key start
LH: loop header
LB: loop body
LE: loop exit
PB: predicated region body
PF: predicated region fallthrough
CT: control target
= control target key end

     0   :  { %s1994_s0 = inlined_call_operand.hbm [shape: f32[8,16,16], index: 0, kind: input, shape index: {}]   ;;  %s1995_s1 = inlined_call_operand.hbm [shape: f32[8,16,16], index: 1, kind: input, shape index: {}]   ;;  %s1996_s2 = inlined_call_operand.hbm [shape: bf16[16,32], index: 2, kind: input, shape index: {}]   ;;  %s1997_s3 = inlined_call_operand.hbm [shape: bf16[16,16], index: 3, kind: input, shape index: {}]   ;;  %s1998_s4 = inlined_call_operand.vmem [shape: bf16[16,16], index: 4, kind: input, shape index: {}]   ;;  %s1999_s5 = inlined_call_operand.vmem [shape: f32[2,8,128], index: 5, kind: output, shape index: {}]  }
   0x1   :  { %2003 = sst [smem:[#allocation14_spill]] %s1994_s0 }
   0x2   :  { %2004 = sst [smem:[#allocation15_spill]] %s1996_s2 }
   0x3   :  { %2005 = sst [smem:[#allocation16_spill]] %s1997_s3 }
   0x4   :  { %10 = vsyncpa [#allocation4], 0 }
   0x5   :  { %12 = vsyncpa [#allocation4 + $0x1], 0 }
   0x6   :  { %13 = vsyncpa [#allocation6], 0 }
   0x7   :  { %15 = vsyncpa [#allocation6 + $0x1], 0 }
   0x8   :  { %16 = vsyncpa [#allocation9], 0  ;;  %s1679_s18 = smov 0   ;;  %s1681_s19 = smov 0  }
   0x9   :  { %s1683_s20 = smov 0   ;;  %s1685_s21 = smov 0  }
   0xa   :  { %s1687_s22 = smov 0   ;;  %s1689_s23 = smov 0  }
   0xb LB: > { %s2002_s24 = sadd.s32 4294967295, %s1637_s23   ;;  %p56_p0 = scmp.ne.s32.totalorder %s1621_s19, %s1617_s18  ;;  %s1637_s23 = sphi %s1689_s23, %s22_s23   ;;  %s1633_s22 = sphi %s1687_s22, %s2020_s22   ;;  %s1629_s21 = sphi %s1685_s21, %s2019_s21   ;;  %s1625_s20 = sphi %s1683_s20, %s2018_s20   ;;  %s1621_s19 = sphi %s1681_s19, %s2017_s19   ;;  %s1617_s18 = sphi %s1679_s18, %s2016_s18  }
   0xc   : > { %p1711_p1 = scmp.eq.s32.totalorder %s2002_s24, 0  ;;  %p1239_p2 = scmp.ge.s32.totalorder %s1637_s23, 1 }
   0xd   : > { %p184_p3 = scmp.lt.s32.totalorder %s1637_s23, 3  ;;  %s1639_s28 = smov [#allocation7]  }
   0xe   : > { %s2006_s25 = scalar_select %p1711_p1, 1, 0 }
   0xf   : > { %p1719_p4 = por %p1711_p1, %p56_p0  ;;  %p1723_p5 = pnand %p1239_p2, %p184_p3 }
  0x10   : > { %s196_s29 = sshll.u32 %s1639_s28, 4  ;;  %s1640_s6 = smov [#allocation8]   ;;  %s197_s29 = int_to_ptr.vmem [resolvable:$true] %s196_s29 }
  0x11   : > { %p1370_p6 = pneg %p1723_p5  ;;  %s209_s7 = sshll.u32 %s1640_s6, 4  ;;  %s210_s7 = int_to_ptr.vmem [resolvable:$true] %s209_s7 }
  0x12   : > { %s1478_s8 = scalar_lea.vmem %s197_s29, 128  ;;  %p1486_p12 = scmp.lt.s32.totalorder %s197_s29, %s197_s29 }
  0x13   : > { %p1731_p7 = pnand %p1370_p6, %p1711_p1  ;;  %p1479_p9 = scmp.ne.s32.totalorder %s197_s29, %s1478_s8 }
  0x14   : > { %p1487_p13 = scmp.lt.s32.totalorder %s1478_s8, %s1478_s8 }
  0x15   : > { %p1469_p8 = pneg %p1731_p7 }
  0x16   : > { %p1488_p0 = por %p1487_p13, %p1486_p12 }
  0x17   : > { %p1481_p10 = pnand %p1479_p9, %p1469_p8 }
  0x19   : > { %p1482_p11 = pneg %p1481_p10 }
  0x1b   : > { %p1489_p2 = pnand %p1488_p0, %p1482_p11 }
  0x1d   : > { %1492 = shalt.err (!%p1489_p2)
}
  0x1e   : > { %s1641_s9 = smov 64   ;;  %s1642_s10 = smov 4  }
  0x1f   : > { %s2010_s2 = sld [smem:[#allocation15_spill]]  ;;  %s1504_s13 = scalar_lea.vmem %s210_s7, 128 }
  0x20   : > { %p1505_p3 = scmp.ne.s32.totalorder %s210_s7, %s1504_s13  ;;  %p1512_p10 = scmp.lt.s32.totalorder %s210_s7, %s210_s7 }
  0x21   : > { %p1513_p1 = scmp.lt.s32.totalorder %s1504_s13, %s1504_s13 }
  0x22   : > { %p1507_p6 = pnand %p1505_p3, %p1469_p8 }
  0x23   : > { %p1514_p12 = por %p1513_p1, %p1512_p10 }
  0x24   : > { %p1508_p9 = pneg %p1507_p6 }
  0x25   : > { %1373 = dma.hbm_to_vmem [thread:$0]  (!%p1731_p7), %s2010_s2, 128, %s197_s29, [#allocation6], %s1641_s9, %s1641_s9, %s1642_s10  }
  0x26   : > { %p1515_p11 = pnand %p1514_p12, %p1508_p9 }
  0x28   : > { %1518 = shalt.err (!%p1515_p11)
}
  0x29   : > { %s2011_s3 = sld [smem:[#allocation16_spill]]  ;;  %s34_s16 = sadd.s32 1, %s1633_s22 }
  0x2a   : > { %s43_s17 = sadd.s32 1, %s1625_s20  ;;  %p36_p1 = scmp.ge.s32.totalorder %s34_s16, 2 }
  0x2b   : > { %p50_p8 = scmp.ne.s32.totalorder %s1625_s20, %s1621_s19  ;;  %p51_p13 = scmp.eq.s32.totalorder %s1637_s23, 0 }
  0x2c   : > { %p1386_p0 = scmp.lt.s32.totalorder %s1637_s23, 2  ;;  %s2022_s16 = smov (%p36_p1, %s34_s16), 0 }
  0x2d   : > { %p52_p2 = por %p51_p13, %p50_p8  ;;  %s226_s18 = sand.u32 1, %s1625_s20  }
  0x2e   : > { %s40_s28 = ssub.s32 %s1633_s22, %s2022_s16  ;;  %s1764_s29 = sshll.u32 %s226_s18, 6 }
  0x2f   : > { %1376 = dma.hbm_to_vmem [thread:$0]  (!%p1731_p7), %s2011_s3, 128, %s210_s7, [#allocation9], %s1641_s9, %s1641_s9, %s1642_s10  }
  0x30   : > { %p41_p3 = scmp.eq.s32.totalorder %s40_s28, 0  ;;  %s1284_s30 = sshll.u32 %s1633_s22, 10 }
  0x31   : > { %s2012_s0 = sld [smem:[#allocation14_spill]]  ;;  %s230_s10 = scalar_lea.vmem [#allocation3], %s1764_s29 }
  0x32   : > { %s1768_s6 = scalar_select %p41_p3, %s1625_s20, %s43_s17  }
  0x33   : > { %s239_s11 = sshll.u32 %s230_s10, 4  ;;  %p1778_p7 = pnand %p1386_p0, %p52_p2  ;;  %s240_s11 = int_to_ptr.vmem [resolvable:$true] %s239_s11 }
  0x34   : > { %s227_s13 = scalar_lea.sflag [#allocation4], %s226_s18  ;;  %s1532_s14 = scalar_lea.vmem %s240_s11, 1024 }
  0x35   : > { %p1521_p6 = pneg %p1778_p7  ;;  %p1533_p9 = scmp.ne.s32.totalorder %s240_s11, %s1532_s14 }
  0x36   : > { %s1643_s15 = smov [#allocation3]  }
  0x37   : > { %s238_s9 = scalar_lea.hbm %s2012_s0, %s1284_s30  ;;  %p1535_p10 = pnand %p1533_p9, %p1521_p6 }
  0x38   : > { %s1537_s17 = sshll.u32 %s1643_s15, 4  ;;  %s1538_s17 = int_to_ptr.vmem [resolvable:$false] %s1537_s17 }
  0x39   : > { %p1536_p12 = pneg %p1535_p10  ;;  %s1539_s28 = scalar_lea.vmem %s1538_s17, 2048 }
  0x3a   : > { %p1540_p11 = scmp.lt.s32.totalorder %s240_s11, %s1538_s17  ;;  %p1541_p1 = scmp.lt.s32.totalorder %s1539_s28, %s1532_s14 }
  0x3c   : > { %p1542_p8 = por %p1541_p1, %p1540_p11 }
  0x3e   : > { %p1543_p13 = pnand %p1542_p8, %p1536_p12 }
  0x40   : > { %1546 = shalt.err (!%p1543_p13)
}
  0x41   : > { %s1644_s7 = smov 128   ;;  %s1645_s18 = smov 8  }
  0x42   : > { %1380 = dma.hbm_to_vmem [thread:$0]  (!%p1778_p7), %s238_s9, 1024, %s240_s11, %s227_s13, %s1644_s7, %s1644_s7, %s1645_s18  }
  0x43   : > { %s261_s15 = scalar_lea.hbm %s1995_s1, %s1284_s30  ;;  %s253_s24 = scalar_lea.vmem [#allocation5], %s1764_s29 }
  0x44   : > { %s262_s17 = sshll.u32 %s253_s24, 4  ;;  %s249_s14 = sand.u32 1, %s1637_s23   ;;  %s263_s17 = int_to_ptr.vmem [resolvable:$true] %s262_s17 }
  0x45   : > { %s250_s28 = scalar_lea.sflag [#allocation6], %s249_s14  ;;  %s1560_s0 = scalar_lea.vmem %s263_s17, 1024 }
  0x46   : > { %p1561_p0 = scmp.ne.s32.totalorder %s263_s17, %s1560_s0  ;;  %s1646_s2 = smov [#allocation5]  }
  0x47   : > { %s1565_s3 = sshll.u32 %s1646_s2, 4  ;;  %s1566_s3 = int_to_ptr.vmem [resolvable:$false] %s1565_s3 }
  0x48   : > { %p1563_p2 = pnand %p1561_p0, %p1521_p6  ;;  %s1567_s9 = scalar_lea.vmem %s1566_s3, 2048 }
  0x49   : > { %p1568_p9 = scmp.lt.s32.totalorder %s263_s17, %s1566_s3  ;;  %p1569_p10 = scmp.lt.s32.totalorder %s1567_s9, %s1560_s0 }
  0x4a   : > { %p1564_p3 = pneg %p1563_p2 }
  0x4b   : > { %p1570_p12 = por %p1569_p10, %p1568_p9 }
  0x4d   : > { %p1571_p11 = pnand %p1570_p12, %p1564_p3 }
  0x4f   : > { %1574 = shalt.err (!%p1571_p11)
}
  0x50   : > { %1383 = dma.hbm_to_vmem [thread:$0]  (!%p1778_p7), %s261_s15, 1024, %s263_s17, %s250_s28, %s1644_s7, %s1644_s7, %s1645_s18  }
  0x51   : > { %274 = sbr.rel (%p1723_p5) target bundleno = 1121 (0x461), region = 40  ;;  %s276_s24 = sand.u32 (!%p1723_p5), 1, %s1621_s19  }
  0x52   : > { %s1252_s29 = sshll.u32 (!%p1723_p5), %s276_s24, 6  ;;  %s277_s30 = scalar_lea.sflag (!%p1723_p5), [#allocation4], %s276_s24 }
  0x53   : > { %s1804_s11 = scalar_lea.vmem (!%p1723_p5), [#allocation3], %s1252_s29 }
  0x56   : > { %1600 = dma.done.wait (%p1719_p4), %s277_s30, 1024  }
  0x57   : > { %1602 = vsyncadd (%p1719_p4), %s277_s30, 4294966272  ;;  %s2014_s0 = sadd.s32 4294967295, %s1637_s23   ;;  %s1812_s12 = scalar_lea.vmem [#allocation5], %s1252_s29 }
  0x58   : > { %s285_s2 = sand.u32 1, %s2014_s0  }
  0x59   : > { %s286_s3 = scalar_lea.sflag [#allocation6], %s285_s2 }
  0x5a   : > { %1604 = dma.done.wait (%p1719_p4), %s286_s3, 1024  }
  0x5b   : > { %1606 = vsyncadd (%p1719_p4), %s286_s3, 4294966272  ;;  %p2015_p5 = scmp.ne.s32.totalorder %s2006_s25, 0 }
  0x5d   : > { %1608 = dma.done.wait (%p2015_p5), [#allocation6], 128  }
  0x5e   : > { %1610 = vsyncadd (%p2015_p5), [#allocation6], 4294967168 }
  0x5f   : > { %1612 = dma.done.wait (%p2015_p5), [#allocation9], 128  }
  0x60   : > { %1614 = vsyncadd (%p2015_p5), [#allocation9], 4294967168  ;;  %v1446_v0 = vld [vmem:[#allocation7] sm:$0xff]   ;;  %v344_v2 = vld [vmem:[%s1804_s11 + $0x8] sm:$0xff]  ;;  %vm379_vm0 = vcmask 130048   ;;  %p332_p4 = scmp.lt.s32.totalorder %s1629_s21, 1 }
  0x61   : > { %v343_v1 = vld [vmem:[%s1804_s11] sm:$0xff]  ;;  %1310 = vmatprep.subr.bf16.mxu0 %v1446_v0  ;;  %v352_v4 = vld [vmem:[%s1812_s12 + $0x8] sm:$0xff]  ;;  %v345_v6 = vld [vmem:[%s1804_s11 + $0x10] sm:$0xff]  ;;  %1356 = vmatprep.subr.bf16.mxu1 %v1446_v0 }
  0x62   : > { %v351_v3 = vld [vmem:[%s1812_s12] sm:$0xff]  ;;  %v346_v7 = vld [vmem:[%s1804_s11 + $0x18] sm:$0xff]  ;;  %1311 = vmatpush3.bf16.msra.mxu0 %v1446_v0  ;;  %v360_v8 = vsub.f32 %v344_v2, %v352_v4  ;;  %v353_v9 = vld [vmem:[%s1812_s12 + $0x10] sm:$0xff]  ;;  %1357 = vmatpush3.bf16.msra.mxu1 %v1446_v0  ;;  %s2024_s21 = smov (!%p332_p4, %s1629_s21), 1 }
  0x63   : > { %v359_v5 = vsub.f32 %v343_v1, %v351_v3  ;;  %v354_v10 = vld [vmem:[%s1812_s12 + $0x18] sm:$0xff]  ;;  %v347_v11 = vld [vmem:[%s1804_s11 + $0x20] sm:$0xff]  ;;  %v361_v12 = vsub.f32 %v345_v6, %v353_v9  ;;  %v348_v14 = vld [vmem:[%s1804_s11 + $0x28] sm:$0xff]  ;;  %s1256_s27 = sshll.u32 %s2024_s21, 3 }
  0x64   : > { %v362_v13 = vsub.f32 %v346_v7, %v354_v10  ;;  %v355_v15 = vld [vmem:[%s1812_s12 + $0x20] sm:$0xff]  ;;  %v356_v16 = vld [vmem:[%s1812_s12 + $0x28] sm:$0xff]  ;;  %v349_v20 = vld [vmem:[%s1804_s11 + $0x30] sm:$0xff]  ;;  %s335_s18 = scalar_lea.vmem %s1999_s5, %s1256_s27 }
  0x65   : > { %v367_v17 = vpack.c.bf16 %v360_v8, %v359_v5  ;;  %v363_v18 = vsub.f32 %v347_v11, %v355_v15  ;;  %v364_v19 = vsub.f32 %v348_v14, %v356_v16  ;;  %v350_v21 = vld [vmem:[%s1804_s11 + $0x38] sm:$0xff]  ;;  %v357_v22 = vld [vmem:[%s1812_s12 + $0x30] sm:$0xff]  ;;  %v1447_v32 = vld [vmem:[#allocation8] sm:$0xff]  }
  0x66   : > { %v368_v23 = vpack.c.bf16 %v362_v13, %v361_v12  ;;  %v358_v24 = vld [vmem:[%s1812_s12 + $0x38] sm:$0xff]  ;;  %v365_v25 = vsub.f32 %v349_v20, %v357_v22  ;;  %1320 = vmatprep.subr.bf16.mxu1 %v1447_v32 }
  0x67   : > { %1312 = vmatprep.mubr.msk.bf16.mxu0 %vm379_vm0, %v367_v17  ;;  %v369_v26 = vpack.c.bf16 %v364_v19, %v363_v18  ;;  %v366_v27 = vsub.f32 %v350_v21, %v358_v24  ;;  %v1448_v33 = vld [vmem:[%s1998_s4] sm:$0xff]  }
  0x68   : > { %1313 = vmatmul.mubr.msk.bf16.vlgmr.msra.gmra.mxu0 %vm379_vm0, %v368_v23  ;;  %1338 = vmatprep.subr.bf16.mxu0 %v1448_v33 }
  0x69   : > { %1316 = vmatprep.mubr.msk.bf16.mxu1 %vm379_vm0, %v369_v26  ;;  %v370_v28 = vpack.c.bf16 %v366_v27, %v365_v25  ;;  %1339 = vmatpush3.bf16.msra.mxu0 %v1448_v33 }
  0x6b   : > { %1317 = vmatmul.mubr.msk.bf16.vlgmr.msra.gmra.mxu1 %vm379_vm0, %v370_v28 }
  0x6c   : > { %1321 = vmatpush3.bf16.msra.mxu1 %v1447_v32 }
 0x128   : > { %v1314_v29 = vpop.f32.mrf.mxu0 }
 0x129   : > { %489 = vxpose.xlu1.b32.start [1/2] (short) (narrow) %v1314_v29, 32 }
 0x12a   : > { %v426_v30 = vpop.f32.mrf.mxu0 }
 0x12b   : > { %457 = vxpose.xlu0.b32.start [1/2] (short) (narrow) %v426_v30, 32  ;;  %v1318_v35 = vpop.f32.mrf.mxu1 }
 0x12c   : > { %v1315_v31 = vpop.f32.mrf.mxu0 }
 0x12d   : > { %490 = vxpose.xlu1.b32.end [2/2] (short) (narrow) %v1315_v31, 32  ;;  %v442_v36 = vpop.f32.mrf.mxu1 }
 0x12e   : > { %v429_v34 = vpop.f32.mrf.mxu0 }
 0x12f   : > { %458 = vxpose.xlu0.b32.end [2/2] (short) (narrow) %v429_v34, 32  ;;  %v1319_v37 = vpop.f32.mrf.mxu1 }
 0x131   : > { %v445_v38 = vpop.f32.mrf.mxu1 }
 0x136   : > { %553 = vxpose.xlu1.b32.start [1/2] (short) (narrow) %v1318_v35, 32 }
 0x138   : > { %521 = vxpose.xlu0.b32.start [1/2] (short) (narrow) %v442_v36, 32 }
 0x13a   : > { %554 = vxpose.xlu1.b32.end [2/2] (short) (narrow) %v1319_v37, 32 }
 0x13c   : > { %522 = vxpose.xlu0.b32.end [2/2] (short) (narrow) %v445_v38, 32 }
 0x1a5   : > { %v505_v39 = vpop.trf.xlu1 }
 0x1a7   : > { %v473_v40 = vpop.trf.xlu0 }
 0x1a9   : > { %v506_v41 = vpop.trf.xlu1 }
 0x1aa   : > { %v587_v49 = vpack.c.bf16 %v506_v41, %v505_v39 }
 0x1ab   : > { %v474_v42 = vpop.trf.xlu0 }
 0x1ac   : > { %v585_v43 = vpack.c.bf16 %v474_v42, %v473_v40 }
 0x1ad   : > { %v507_v44 = vpop.trf.xlu1 }
 0x1ae   : > { %1322 = vmatprep.mubr.msk.bf16.mxu1 %vm379_vm0, %v585_v43  ;;  %1340 = vmatprep.mubr.msk.bf16.mxu0 %vm379_vm0, %v585_v43 }
 0x1af   : > { %v475_v45 = vpop.trf.xlu0 }
 0x1b1   : > { %v508_v46 = vpop.trf.xlu1 }
 0x1b2   : > { %v588_v53 = vpack.c.bf16 %v508_v46, %v507_v44 }
 0x1b3   : > { %v476_v47 = vpop.trf.xlu0 }
 0x1b4   : > { %v586_v48 = vpack.c.bf16 %v476_v47, %v475_v45 }
 0x1b5   : > { %v569_v51 = vpop.trf.xlu1 }
 0x1b6   : > { %1323 = vmatmul.mubr.msk.bf16.vlgmr.msra.gmra.mxu1 %vm379_vm0, %v586_v48  ;;  %1341 = vmatmul.mubr.msk.bf16.vlgmr.msra.gmra.mxu0 %vm379_vm0, %v586_v48 }
 0x1b7   : > { %1326 = vmatprep.mubr.msk.bf16.mxu1 %vm379_vm0, %v587_v49  ;;  %1344 = vmatprep.mubr.msk.bf16.mxu0 %vm379_vm0, %v587_v49  ;;  %v537_v50 = vpop.trf.xlu0 }
 0x1b9   : > { %v570_v55 = vpop.trf.xlu1 }
 0x1ba   : > { %v591_v60 = vpack.c.bf16 %v570_v55, %v569_v51 }
 0x1bb   : > { %v538_v52 = vpop.trf.xlu0 }
 0x1bc   : > { %v589_v54 = vpack.c.bf16 %v538_v52, %v537_v50 }
 0x1bd   : > { %v571_v57 = vpop.trf.xlu1 }
 0x1be   : > { %1327 = vmatmul.mubr.msk.bf16.gmra.mxu1 %vm379_vm0, %v588_v53  ;;  %1345 = vmatmul.mubr.msk.bf16.gmra.mxu0 %vm379_vm0, %v588_v53 }
 0x1bf   : > { %1330 = vmatprep.mubr.msk.bf16.mxu1 %vm379_vm0, %v589_v54  ;;  %1348 = vmatprep.mubr.msk.bf16.mxu0 %vm379_vm0, %v589_v54  ;;  %v539_v56 = vpop.trf.xlu0 }
 0x1c1   : > { %v572_v61 = vpop.trf.xlu1 }
 0x1c2   : > { %v592_v62 = vpack.c.bf16 %v572_v61, %v571_v57 }
 0x1c3   : > { %v540_v58 = vpop.trf.xlu0 }
 0x1c4   : > { %v590_v59 = vpack.c.bf16 %v540_v58, %v539_v56 }
 0x1c6   : > { %1331 = vmatmul.mubr.msk.bf16.gmra.mxu1 %vm379_vm0, %v590_v59  ;;  %1349 = vmatmul.mubr.msk.bf16.gmra.mxu0 %vm379_vm0, %v590_v59 }
 0x1c7   : > { %1334 = vmatprep.mubr.msk.bf16.mxu1 %vm379_vm0, %v591_v60  ;;  %1352 = vmatprep.mubr.msk.bf16.mxu0 %vm379_vm0, %v591_v60 }
 0x1ce   : > { %1335 = vmatmul.mubr.msk.bf16.gmra.mxu1 %vm379_vm0, %v592_v62  ;;  %1353 = vmatmul.mubr.msk.bf16.gmra.mxu0 %vm379_vm0, %v592_v62 }
 0x276   : > { %v1324_v63 = vpop.f32.mrf.mxu1  ;;  %v1342_v0 = vpop.f32.mrf.mxu0 }
 0x278   : > { %v659_v1 = vpop.f32.mrf.mxu1  ;;  %v764_v2 = vpop.f32.mrf.mxu0 }
 0x279   : > { %v827_v3 = vsub.f32 %v659_v1, %v1342_v0  ;;  %v835_v4 = vadd.f32 %v1324_v63, %v764_v2 }
 0x27a   : > { %v1325_v5 = vpop.f32.mrf.mxu1  ;;  %v1343_v6 = vpop.f32.mrf.mxu0 }
 0x27b   : > { %v843_v7 = vmul.f32 %v827_v3, %v827_v3  ;;  %v851_v8 = vmul.f32 %v835_v4, %v835_v4 }
 0x27c   : > { %v662_v9 = vpop.f32.mrf.mxu1  ;;  %v767_v10 = vpop.f32.mrf.mxu0 }
 0x27d   : > { %v1865_v11 = vadd.f32 %v851_v8, %v843_v7  ;;  %v828_v12 = vsub.f32 %v662_v9, %v1343_v6  ;;  %v836_v13 = vadd.f32 %v1325_v5, %v767_v10 }
 0x27e   : > { %v1328_v14 = vpop.f32.mrf.mxu1  ;;  %v1346_v15 = vpop.f32.mrf.mxu0 }
 0x27f   : > { %v844_v16 = vmul.f32 %v828_v12, %v828_v12  ;;  %v852_v17 = vmul.f32 %v836_v13, %v836_v13  ;;  %v867_v18 = vsel %vm379_vm0, %v1865_v11, -inf  ;;  %1449 = vrsqrt.f32 %v1865_v11 }
 0x280   : > { %v780_v19 = vpop.f32.mrf.mxu0  ;;  %868 = vmax.xlane.f32.xlu0 %v867_v18  ;;  %v675_v20 = vpop.f32.mrf.mxu1  ;;  %vm952_vm1 = vcmp.eq.f32.partialorder %v1865_v11, inf  ;;  %v955_v4 = vand.u32 2147483648, %v1865_v11  ;;  %vm954_vm2 = vcmp.eq.f32.partialorder %v1865_v11, 0.0 }
 0x281   : > { %v1870_v21 = vadd.f32 %v852_v17, %v844_v16  ;;  %v837_v22 = vadd.f32 %v1328_v14, %v780_v19  ;;  %v829_v23 = vsub.f32 %v675_v20, %v1346_v15 }
 0x282   : > { %v1329_v24 = vpop.f32.mrf.mxu1  ;;  %v1347_v25 = vpop.f32.mrf.mxu0 }
 0x283   : > { %v853_v26 = vmul.f32 %v837_v22, %v837_v22  ;;  %v845_v27 = vmul.f32 %v829_v23, %v829_v23  ;;  %v870_v28 = vsel %vm379_vm0, %v1870_v21, -inf  ;;  %1451 = vrsqrt.f32 %v1870_v21 }
 0x284   : > { %v783_v29 = vpop.f32.mrf.mxu0  ;;  %871 = vmax.xlane.f32.xlu1 %v870_v28  ;;  %v678_v30 = vpop.f32.mrf.mxu1  ;;  %vm959_vm3 = vcmp.eq.f32.partialorder %v1870_v21, inf  ;;  %vm961_vm4 = vcmp.eq.f32.partialorder %v1870_v21, 0.0  ;;  %v962_v17 = vand.u32 2147483648, %v1870_v21 }
 0x285   : > { %v1875_v31 = vadd.f32 %v853_v26, %v845_v27  ;;  %v838_v32 = vadd.f32 %v1329_v24, %v783_v29  ;;  %v830_v33 = vsub.f32 %v678_v30, %v1347_v25 }
 0x286   : > { %v1332_v34 = vpop.f32.mrf.mxu1  ;;  %v1350_v35 = vpop.f32.mrf.mxu0 }
 0x287   : > { %v854_v36 = vmul.f32 %v838_v32, %v838_v32  ;;  %v846_v37 = vmul.f32 %v830_v33, %v830_v33  ;;  %v873_v38 = vsel %vm379_vm0, %v1875_v31, -inf  ;;  %1453 = vrsqrt.f32 %v1875_v31 }
 0x288   : > { %874 = vmax.xlane.f32.xlu1 %v873_v38  ;;  %v691_v39 = vpop.f32.mrf.mxu1  ;;  %v796_v40 = vpop.f32.mrf.mxu0  ;;  %vm966_vm5 = vcmp.eq.f32.partialorder %v1875_v31, inf  ;;  %vm968_vm6 = vcmp.eq.f32.partialorder %v1875_v31, 0.0  ;;  %v969_v24 = vand.u32 2147483648, %v1875_v31 }
 0x289   : > { %v1880_v41 = vadd.f32 %v854_v36, %v846_v37  ;;  %v831_v42 = vsub.f32 %v691_v39, %v1350_v35  ;;  %v839_v43 = vadd.f32 %v1332_v34, %v796_v40 }
 0x28a   : > { %v1333_v44 = vpop.f32.mrf.mxu1  ;;  %v1351_v45 = vpop.f32.mrf.mxu0 }
 0x28b   : > { %v847_v46 = vmul.f32 %v831_v42, %v831_v42  ;;  %v855_v47 = vmul.f32 %v839_v43, %v839_v43  ;;  %v876_v48 = vsel %vm379_vm0, %v1880_v41, -inf  ;;  %1455 = vrsqrt.f32 %v1880_v41 }
 0x28c   : > { %v1450_v49 = vpop.eup %1449  ;;  %877 = vmax.xlane.f32.xlu1 %v876_v48  ;;  %v694_v50 = vpop.f32.mrf.mxu1  ;;  %vm973_vm7 = vcmp.eq.f32.partialorder %v1880_v41, inf  ;;  %vm975_vm8 = vcmp.eq.f32.partialorder %v1880_v41, 0.0  ;;  %v976_v36 = vand.u32 2147483648, %v1880_v41 }
 0x28d   : > { %v799_v51 = vpop.f32.mrf.mxu0  ;;  %v1885_v52 = vadd.f32 %v855_v47, %v847_v46  ;;  %v832_v53 = vsub.f32 %v694_v50, %v1351_v45  ;;  %v951_v55 = vmul.f32 %v1450_v49, %v1865_v11 }
 0x28e   : > { %v840_v54 = vadd.f32 %v1333_v44, %v799_v51  ;;  %v1336_v56 = vpop.f32.mrf.mxu1 }
 0x28f   : > { %v1354_v57 = vpop.f32.mrf.mxu0  ;;  %v848_v58 = vmul.f32 %v832_v53, %v832_v53  ;;  %v879_v60 = vsel %vm379_vm0, %v1885_v52, -inf  ;;  %v953_v0 = vsel %vm952_vm1, %v1865_v11, %v951_v55  ;;  %1457 = vrsqrt.f32 %v1885_v52 }
 0x290   : > { %v856_v59 = vmul.f32 %v840_v54, %v840_v54  ;;  %v1452_v61 = vpop.eup %1451  ;;  %880 = vmax.xlane.f32.xlu0 %v879_v60  ;;  %v707_v63 = vpop.f32.mrf.mxu1  ;;  %v956_v12 = vsel %vm954_vm2, %v955_v4, %v953_v0  ;;  %vm980_vm9 = vcmp.eq.f32.partialorder %v1885_v52, inf  ;;  %v983_v45 = vand.u32 2147483648, %v1885_v52 }
 0x291   : > { %v812_v62 = vpop.f32.mrf.mxu0  ;;  %v833_v3 = vsub.f32 %v707_v63, %v1354_v57  ;;  %v958_v7 = vmul.f32 %v1452_v61, %v1870_v21  ;;  %v1006_v23 = vmul.f32 %v956_v12, %v1865_v11  ;;  %vm982_vm10 = vcmp.eq.f32.partialorder %v1885_v52, 0.0 }
 0x292   : > { %v1893_v1 = vadd.f32 %v856_v59, %v848_v58  ;;  %v841_v2 = vadd.f32 %v1336_v56, %v812_v62  ;;  %v1337_v5 = vpop.f32.mrf.mxu1  ;;  %vm910_vm2 = vcmask 130112  }
 0x293   : > { %v1355_v6 = vpop.f32.mrf.mxu0  ;;  %v849_v9 = vmul.f32 %v833_v3, %v833_v3  ;;  %v960_v16 = vsel %vm959_vm3, %v1870_v21, %v958_v7  ;;  %v1014_v34 = vsel %vm379_vm0, %v1006_v23, 0.0  ;;  %vm941_vm3 = vcmask 1042434  }
 0x294   : > { %v857_v8 = vmul.f32 %v841_v2, %v841_v2  ;;  %v882_v10 = vsel %vm379_vm0, %v1893_v1, -inf  ;;  %v1454_v13 = vpop.eup %1453  ;;  %v710_v15 = vpop.f32.mrf.mxu1  ;;  %1459 = vrsqrt.f32 %v1893_v1  ;;  %v963_v25 = vsel %vm961_vm4, %v962_v17, %v960_v16 }
 0x295   : > { %v815_v14 = vpop.f32.mrf.mxu0  ;;  %883 = vmax.xlane.f32.xlu1 %v882_v10  ;;  %v834_v20 = vsub.f32 %v710_v15, %v1355_v6  ;;  %v965_v22 = vmul.f32 %v1454_v13, %v1875_v31  ;;  %v1007_v35 = vmul.f32 %v963_v25, %v1870_v21  ;;  %vm987_vm11 = vcmp.eq.f32.partialorder %v1893_v1, inf }
 0x296   : > { %v1906_v18 = vadd.f32 %v857_v8, %v849_v9  ;;  %v842_v19 = vadd.f32 %v1337_v5, %v815_v14  ;;  %v990_v53 = vand.u32 2147483648, %v1893_v1  ;;  %vm989_vm12 = vcmp.eq.f32.partialorder %v1893_v1, 0.0 }
 0x297   : > { %v850_v27 = vmul.f32 %v834_v20, %v834_v20  ;;  %v967_v29 = vsel %vm966_vm5, %v1875_v31, %v965_v22  ;;  %v1017_v44 = vsel %vm379_vm0, %v1007_v35, 0.0  ;;  %v899_v8 = vlaneseq }
 0x298   : > { %v858_v26 = vmul.f32 %v842_v19, %v842_v19  ;;  %v885_v28 = vsel %vm379_vm0, %v1906_v18, -inf  ;;  %v1456_v30 = vpop.eup %1455  ;;  %v970_v32 = vsel %vm968_vm6, %v969_v24, %v967_v29  ;;  %1461 = vrsqrt.f32 %v1906_v18 }
 0x299   : > { %886 = vmax.xlane.f32.xlu0 %v885_v28  ;;  %v972_v33 = vmul.f32 %v1456_v30, %v1880_v41  ;;  %v1008_v38 = vmul.f32 %v970_v32, %v1875_v31  ;;  %vm994_vm13 = vcmp.eq.f32.partialorder %v1906_v18, inf  ;;  %v997_v58 = vand.u32 2147483648, %v1906_v18 }
 0x29a   : > { %v866_v11 = vadd.f32 %v858_v26, %v850_v27  ;;  %vm996_vm14 = vcmp.eq.f32.partialorder %v1906_v18, 0.0  ;;  %v900_v10 = vand.u32 127, %v899_v8  ;;  %v902_v15 = vshrl.u32 %v899_v8, 7 }
 0x29b   : > { %v974_v39 = vsel %vm973_vm7, %v1880_v41, %v972_v33  ;;  %v1020_v21 = vsel %vm379_vm0, %v1008_v38, 0.0  ;;  %vm943_vm4 = vcmask 1043459   ;;  %vm946_vm5 = vcmask 125952  }
 0x29c   : > { %v888_v37 = vsel %vm379_vm0, %v866_v11, -inf  ;;  %1463 = vrsqrt.f32 %v866_v11  ;;  %v977_v40 = vsel %vm975_vm8, %v976_v36, %v974_v39  ;;  %v1458_v42 = vpop.eup %1457  ;;  %vm1001_vm15 = vcmp.eq.f32.partialorder %v866_v11, inf }
 0x29d   : > { %1015 = vadd.xlane.f32.xlu0 %v1014_v34  ;;  %889 = vmax.xlane.f32.xlu1 %v888_v37  ;;  %v979_v43 = vmul.f32 %v1458_v42, %v1885_v52  ;;  %v1009_v46 = vmul.f32 %v977_v40, %v1880_v41  ;;  %vm1003_vm1 = vcmp.eq.f32.partialorder %v866_v11, 0.0  ;;  %v905_v13 = vadd.s32 4294967288, %v900_v10 }
 0x29e   : > { %v903_v19 = vsub.s32 %v900_v10, %v902_v15  ;;  %vm341_vm6 = vcmask 0   ;;  %vm1094_vm7 = vcmask 1043456  }
 0x29f   : > { %v981_v31 = vsel %vm980_vm9, %v1885_v52, %v979_v43  ;;  %v1023_v51 = vsel %vm379_vm0, %v1009_v46, 0.0  ;;  %v908_v17 = vsub.s32 %v905_v13, %v902_v15 }
 0x2a0   : > { %v984_v48 = vsel %vm982_vm10, %v983_v45, %v981_v31 }
 0x2a1   : > { %1021 = vadd.xlane.f32.xlu0 %v1020_v21  ;;  %1018 = vadd.xlane.f32.xlu1 %v1017_v44  ;;  %v1460_v47 = vpop.eup %1459  ;;  %v1010_v49 = vmul.f32 %v984_v48, %v1885_v52  ;;  %v1647_v48 = vmov 0.0  }
 0x2a2   : > { %v986_v50 = vmul.f32 %v1460_v47, %v1893_v1  ;;  %342 = vst.msk [vmem:[#allocation2] sm:$0x1] %vm341_vm6, %v1647_v48 }
 0x2a3   : > { %v1026_v41 = vsel %vm379_vm0, %v1010_v49, 0.0 }
 0x2a4   : > { %v988_v54 = vsel %vm987_vm11, %v1893_v1, %v986_v50 }
 0x2a5   : > { %1024 = vadd.xlane.f32.xlu1 %v1023_v51  ;;  %v1462_v55 = vpop.eup %1461  ;;  %1027 = vadd.xlane.f32.xlu0 %v1026_v41  ;;  %v991_v56 = vsel %vm989_vm12, %v990_v53, %v988_v54 }
 0x2a6   : > { %v1011_v52 = vmul.f32 %v991_v56, %v1893_v1  ;;  %v993_v57 = vmul.f32 %v1462_v55, %v1906_v18  ;;  %v1004_v1 = vand.u32 2147483648, %v866_v11 }
 0x2a8   : > { %v1029_v60 = vsel %vm379_vm0, %v1011_v52, 0.0  ;;  %v995_v61 = vsel %vm994_vm13, %v1906_v18, %v993_v57 }
 0x2a9   : > { %v1464_v59 = vpop.eup %1463  ;;  %1030 = vadd.xlane.f32.xlu1 %v1029_v60  ;;  %v998_v62 = vsel %vm996_vm14, %v997_v58, %v995_v61  ;;  %v1093_v10 = vld [vmem:[#allocation2] sm:$0x1] }
 0x2aa   : > { %v1000_v63 = vmul.f32 %v1464_v59, %v866_v11  ;;  %v1012_v0 = vmul.f32 %v998_v62, %v1906_v18  ;;  %v1648_v62 = vmov 0  }
 0x2ab   : > { %1445 = vset.pattern.permute.xlu0 %v1648_v62 }
 0x2ac   : > { %v1002_v2 = vsel %vm1001_vm15, %v866_v11, %v1000_v63  ;;  %v1032_v3 = vsel %vm379_vm0, %v1012_v0, 0.0 }
 0x2ad   : > { %v1005_v4 = vsel %vm1003_vm1, %v1004_v1, %v1002_v2  ;;  %1033 = vadd.xlane.f32.xlu0 %v1032_v3 }
 0x2ae   : > { %v1013_v5 = vmul.f32 %v1005_v4, %v866_v11 }
 0x2b0   : > { %v1035_v6 = vsel %vm379_vm0, %v1013_v5, 0.0  ;;  %vm939_vm0 = vcmask 1041409  }
 0x2b1   : > { %1036 = vadd.xlane.f32.xlu1 %v1035_v6 }
 0x309   : > { %v869_v12 = vpop.xlane.xlu0 %868 }
 0x30a   : > { %v904_v27 = vrot.slane %v869_v12, %v903_v19 }
 0x30d   : > { %v872_v7 = vpop.xlane.xlu1 %871 }
 0x30e   : > { %v909_v24 = vrot.slane %v872_v7, %v908_v17 }
 0x310   : > { %v911_v32 = vsel %vm910_vm2, %v909_v24, %v904_v27 }
 0x311   : > { %v875_v9 = vpop.xlane.xlu1 %874 }
 0x312   : > { %v915_v25 = vrot.slane %v875_v9, %v903_v19 }
 0x315   : > { %v878_v14 = vpop.xlane.xlu1 %877 }
 0x316   : > { %v919_v20 = vrot.slane %v878_v14, %v908_v17 }
 0x318   : > { %v920_v28 = vsel %vm910_vm2, %v919_v20, %v915_v25 }
 0x319   : > { %v881_v16 = vpop.xlane.xlu0 %880  ;;  %v940_v35 = vsel %vm939_vm0, %v920_v28, %v911_v32 }
 0x31a   : > { %v924_v26 = vrot.slane %v881_v16, %v903_v19 }
 0x31e   : > { %v884_v18 = vpop.xlane.xlu1 %883 }
 0x31f   : > { %v928_v22 = vrot.slane %v884_v18, %v908_v17 }
 0x321   : > { %v929_v29 = vsel %vm910_vm2, %v928_v22, %v924_v26 }
 0x322   : > { %v887_v23 = vpop.xlane.xlu0 %886  ;;  %v942_v37 = vsel %vm941_vm3, %v929_v29, %v940_v35 }
 0x323   : > { %v933_v11 = vrot.slane %v887_v23, %v903_v19 }
 0x326   : > { %v890_v30 = vpop.xlane.xlu1 %889  ;;  %v1016_v34 = vpop.xlane.xlu0 %1015 }
 0x327   : > { %v937_v33 = vrot.slane %v890_v30, %v908_v17  ;;  %v1049_v51 = vrot.slane %v1016_v34, %v903_v19 }
 0x329   : > { %v938_v36 = vsel %vm910_vm2, %v937_v33, %v933_v11 }
 0x32a   : > { %v1019_v38 = vpop.xlane.xlu1 %1018  ;;  %v944_v39 = vsel %vm943_vm4, %v938_v36, %v942_v37  ;;  %v1022_v42 = vpop.xlane.xlu0 %1021 }
 0x32b   : > { %v947_v40 = vsel %vm946_vm5, %v944_v39, -inf  ;;  %v1053_v31 = vrot.slane %v1019_v38, %v908_v17  ;;  %v1058_v47 = vrot.slane %v1022_v42, %v903_v19 }
 0x32c   : > { %948 = vmax.xlane.f32.xlu0 %v947_v40 }
 0x32d   : > { %v1054_v55 = vsel %vm910_vm2, %v1053_v31, %v1049_v51 }
 0x32e   : > { %v1025_v43 = vpop.xlane.xlu1 %1024  ;;  %v1028_v44 = vpop.xlane.xlu0 %1027 }
 0x32f   : > { %v1062_v45 = vrot.slane %v1025_v43, %v908_v17  ;;  %v1067_v49 = vrot.slane %v1028_v44, %v903_v19 }
 0x331   : > { %v1063_v53 = vsel %vm910_vm2, %v1062_v45, %v1058_v47 }
 0x332   : > { %v1031_v21 = vpop.xlane.xlu1 %1030  ;;  %v1082_v57 = vsel %vm939_vm0, %v1063_v53, %v1054_v55 }
 0x333   : > { %v1071_v46 = vrot.slane %v1031_v21, %v908_v17 }
 0x335   : > { %v1072_v41 = vsel %vm910_vm2, %v1071_v46, %v1067_v49 }
 0x336   : > { %v1034_v50 = vpop.xlane.xlu0 %1033  ;;  %v1083_v59 = vsel %vm941_vm3, %v1072_v41, %v1082_v57 }
 0x337   : > { %v1076_v56 = vrot.slane %v1034_v50, %v903_v19 }
 0x33a   : > { %v1037_v54 = vpop.xlane.xlu1 %1036 }
 0x33b   : > { %v1080_v52 = vrot.slane %v1037_v54, %v908_v17 }
 0x33d   : > { %v1081_v58 = vsel %vm910_vm2, %v1080_v52, %v1076_v56 }
 0x33e   : > { %v1084_v60 = vsel %vm943_vm4, %v1081_v58, %v1083_v59 }
 0x33f   : > { %v1086_v61 = vsel %vm946_vm5, %v1084_v60, 0.0 }
 0x340   : > { %1087 = vadd.xlane.f32.xlu1 %v1086_v61 }
 0x3b5   : > { %v949_v63 = vpop.xlane.xlu0 %948 }
 0x3b6   : > { %1465 = vrsqrt.f32 %v949_v63  ;;  %vm1091_vm8 = vcmp.gt.f32.partialorder %v949_v63, 0.0 }
 0x3c3   : > { %v1466_v0 = vpop.eup %1465 }
 0x3c9   : > { %v1088_v1 = vpop.xlane.xlu1 %1087 }
 0x3ca   : > { %v1090_v2 = vmul.f32 %v1466_v0, %v1088_v1 }
 0x3cc   : > { %v1092_v3 = vsel %vm1091_vm8, %v1090_v2, 0.0 }
 0x3cd   : > { %v1095_v4 = vsel %vm1094_vm7, %v1092_v3, 0.0 }
 0x3ce   : > { %v1096_v5 = vrot.slane %v1095_v4, 4 }
 0x3d0   : > { %v1097_v6 = vadd.f32 %v1096_v5, %v1095_v4 }
 0x3d2   : > { %v1098_v7 = vrot.slane %v1097_v6, 2 }
 0x3d4   : > { %v1099_v8 = vadd.f32 %v1098_v7, %v1097_v6 }
 0x3d6   : > { %v1100_v9 = vrot.slane %v1099_v8, 1 }
 0x3d8   : > { %v1101_v12 = vadd.f32 %v1100_v9, %v1099_v8 }
 0x3da   : > { %v1102_v13 = vadd.f32 %v1101_v12, %v1093_v10 }
 0x3dc   : > { %1104 = vst.msk [vmem:[#allocation2] sm:$0x1] %vm341_vm6, %v1102_v13 }
 0x3e3   : > { %v1280_v14 = vld [vmem:[#allocation2] ss:$0 sm:$0xff] }
 0x3e4   : > { %1115 = vperm.xlu0 %1445, %v1280_v14  }
 0x45f   : > { %v1116_v15 = vpop.permute.xlu0 %1115 }
 0x460   : > { %1119 = vst [vmem:[%s335_s18] sm:$0xff] %v1116_v15 }
 0x461 PF: > { %s22_s23 = sadd.s32 1, %s1637_s23   ;;  %s2016_s18 = smov %s1621_s19 }
 0x462   : > { %p19_p7 = scmp.ge.s32.totalorder %s22_s23, 4   ;;  %s2017_s19 = smov %s1625_s20 }
 0x463   : > { %s2018_s20 = smov %s1768_s6  ;;  %s2019_s21 = smov %s1633_s22 }
 0x464   : > { %s2020_s22 = smov %s2022_s16  ;;  %21 = sbr.rel (!%p19_p7) target bundleno = 11 (0xb), region = 109 }
 0x469   :  { %1139 = vsyncpa [#allocation4], 1 }
 0x46a   :  { %1141 = vsyncpa [#allocation4 + $0x1], 1 }
 0x46b   :  { %1142 = vsyncpa [#allocation6], 1 }
 0x46c   :  { %1144 = vsyncpa [#allocation6 + $0x1], 1 }
 0x46d   :  { %1145 = vsyncpa [#allocation9], 1 }

</bundles_post_ra>
